<compile_context>
chip_gen: v7x
topology: tpu7x:2x2x1
jax: 0.10.0
libtpu: 0.0.40
codegen_flags: <defaults>
</compile_context>

<pallas_src>
import functools

import jax
import jax.numpy as jnp
from jax.experimental import pallas as pl
from jax.experimental.pallas import tpu as pltpu

LANES = 128
_TARGET_BLOCK_BYTES = 1 << 20  # ~1 MiB per block (measured sweet spot)


def _binary_zero_kernel(x_ref, o_ref, *, s1, s2, b1, fused):
    x = x_ref[...]
    dt = o_ref.dtype
    bval = jnp.asarray(b1, dt)
    zero = jnp.asarray(0.0, dt)
    hi = jnp.asarray(s2, dt)
    lo = jnp.asarray(s1, dt)
    if fused:
        # s1 <= s2: the two indicator regions are disjoint -> single select.
        o_ref[...] = jnp.where((x > hi) | (x < lo), bval, zero)
    else:
        # s1 > s2: regions may overlap and then contribute 2*b1 (matches ref).
        o_ref[...] = (jnp.where(x > hi, bval, zero)
                      + jnp.where(x < lo, bval, zero))


def binary_zero_pallas(x, s1: float, s2: float, b1: float):
    """Elementwise Binary_Zero forward, computed in a Pallas TPU kernel."""
    orig_shape = x.shape
    dtype = x.dtype
    n = x.size
    itemsize = jnp.dtype(dtype).itemsize

    # Sublane multiple for the block's second-to-last dim (dtype packing).
    sub = {4: 8, 2: 16, 1: 32}.get(itemsize, 8)

    # Flatten to a lane-dense (rows, 128) slab.  Pad only if n % 128 != 0
    # (pad is at most 127 elements); no extra HBM pass in the common case.
    flat = x.reshape(-1)
    pad = (-n) % LANES
    if pad:
        flat = jnp.concatenate([flat, jnp.zeros((pad,), dtype=dtype)])
    rows = flat.size // LANES
    slab = flat.reshape(rows, LANES)

    # ~1 MiB blocks along the row axis; full-array block if it is smaller.
    tile_rows = max(sub, (_TARGET_BLOCK_BYTES // (LANES * itemsize)) // sub * sub)
    if rows <= tile_rows:
        block_rows = rows          # full array dims -> exempt from (8,128) rule
        grid = (1,)
    else:
        block_rows = tile_rows     # multiple of `sub`; last block may be partial
        grid = (pl.cdiv(rows, tile_rows),)

    kernel = functools.partial(
        _binary_zero_kernel,
        s1=float(s1), s2=float(s2), b1=float(b1),
        fused=(float(s1) <= float(s2)),
    )

    out_slab = pl.pallas_call(
        kernel,
        out_shape=jax.ShapeDtypeStruct((rows, LANES), dtype),
        grid_spec=pltpu.PrefetchScalarGridSpec(
            num_scalar_prefetch=0,
            grid=grid,
            in_specs=[pl.BlockSpec((block_rows, LANES), lambda i: (i, 0))],
            out_specs=pl.BlockSpec((block_rows, LANES), lambda i: (i, 0)),
        ),
        compiler_params=pltpu.CompilerParams(
            dimension_semantics=("parallel",),
        ),
        cost_estimate=pl.CostEstimate(
            flops=3 * rows * LANES,
            transcendentals=0,
            bytes_accessed=2 * rows * LANES * itemsize,
        ),
    )(slab)

    if pad:
        return out_slab.reshape(-1)[:n].reshape(orig_shape)
    return out_slab.reshape(orig_shape)


def binary_zero_ref(x, s1, s2, b1):
    """Pure-JAX reference mirroring the PyTorch module."""
    dt = x.dtype
    h_pos = jnp.where(x > jnp.asarray(s2, dt), 1.0, 0.0)
    h_neg = jnp.where(x < jnp.asarray(s1, dt), 1.0, 0.0)
    return (b1 * (h_pos + h_neg)).astype(dt)


if __name__ == "__main__":
    key = jax.random.PRNGKey(0)

    # Main check: module parameters Binary_Zero(s1=-0.5, s2=0.5, b1=2.0),
    # NCHW input (2, 4, 16, 16).
    s1, s2, b1 = -0.5, 0.5, 2.0
    x = jax.random.normal(key, (2, 4, 16, 16), dtype=jnp.float32)
    out = jax.block_until_ready(binary_zero_pallas(x, s1, s2, b1))
    ref = binary_zero_ref(x, s1, s2, b1)
    assert out.shape == x.shape and out.dtype == x.dtype
    assert jnp.allclose(out, ref), "mismatch vs reference (fused path)"

    # Padding path (size not a multiple of 128) + overlapping thresholds
    # (s1 > s2 -> regions overlap, output can be 2*b1; exercises summed path).
    x2 = jax.random.normal(jax.random.PRNGKey(1), (3, 5, 7, 9), dtype=jnp.float32)
    out2 = jax.block_until_ready(binary_zero_pallas(x2, 0.5, -0.5, 3.0))
    ref2 = binary_zero_ref(x2, 0.5, -0.5, 3.0)
    assert jnp.allclose(out2, ref2), "mismatch vs reference (summed/pad path)"

    # bf16 path (stays packed in-dtype inside the kernel).
    x3 = jax.random.normal(jax.random.PRNGKey(2), (2, 4, 16, 16), dtype=jnp.bfloat16)
    out3 = jax.block_until_ready(binary_zero_pallas(x3, s1, s2, b1))
    ref3 = binary_zero_ref(x3, s1, s2, b1)
    assert out3.dtype == jnp.bfloat16
    assert jnp.allclose(out3.astype(jnp.float32), ref3.astype(jnp.float32)), \
        "mismatch vs reference (bf16 path)"

    print("KERNEL_OK")
</pallas_src>

<mosaic_0001>
module attributes {stable_mosaic.version = 11 : i64} {
  func.func @_binary_zero_kernel(%arg0: i32, %arg1: memref<16x128xf32, #tpu.memory_space<vmem>>, %arg2: memref<16x128xf32, #tpu.memory_space<vmem>>) attributes {dimension_semantics = [#tpu.dimension_semantics<parallel>], iteration_bounds = array<i64: 1>, scalar_prefetch = 0 : i64, scratch_operands = 0 : i64, tpu.core_type = #tpu.core_type<tc>, window_params = [{transform_indices = @transform_0, window_bounds = array<i64: 16, 128>}, {transform_indices = @transform_1, window_bounds = array<i64: 16, 128>}]} {
    %c0 = arith.constant 0 : index
    %c0_0 = arith.constant 0 : index
    %0 = vector.load %arg1[%c0, %c0_0] : memref<16x128xf32, #tpu.memory_space<vmem>>, vector<16x128xf32>
    %cst = arith.constant 5.000000e-01 : f32
    %1 = vector.broadcast %cst : f32 to vector<16x128xf32>
    %2 = arith.cmpf ogt, %0, %1 : vector<16x128xf32>
    %cst_1 = arith.constant -5.000000e-01 : f32
    %3 = vector.broadcast %cst_1 : f32 to vector<16x128xf32>
    %4 = arith.cmpf olt, %0, %3 : vector<16x128xf32>
    %5 = arith.ori %2, %4 : vector<16x128xi1>
    %cst_2 = arith.constant 2.000000e+00 : f32
    %cst_3 = arith.constant 0.000000e+00 : f32
    %6 = vector.broadcast %cst_2 : f32 to vector<16x128xf32>
    %7 = vector.broadcast %cst_3 : f32 to vector<16x128xf32>
    %8 = arith.select %5, %6, %7 : vector<16x128xi1>, vector<16x128xf32>
    %c0_4 = arith.constant 0 : index
    %c0_5 = arith.constant 0 : index
    %9 = vector.load %arg2[%c0_4, %c0_5] : memref<16x128xf32, #tpu.memory_space<vmem>>, vector<16x128xf32>
    tpu.vector_store %arg2[%c0_4, %c0_5], %8 {strides = array<i32>} : memref<16x128xf32, #tpu.memory_space<vmem>>, vector<16x128xf32>,
    return
  }
  func.func @transform_0(%arg0: i32) -> (i32, i32) {
    %c0_i32 = arith.constant 0 : i32
    %c0_i32_0 = arith.constant 0 : i32
    return %arg0, %c0_i32 : i32, i32
  }
  func.func @transform_1(%arg0: i32) -> (i32, i32) {
    %c0_i32 = arith.constant 0 : i32
    %c0_i32_0 = arith.constant 0 : i32
    return %arg0, %c0_i32 : i32, i32
  }
}

</mosaic_0001>

<bundles_post_ra>
// kernel: tpu_custom_call.1
= control target key start
LH: loop header
LB: loop body
LE: loop exit
PB: predicated region body
PF: predicated region fallthrough
CT: control target
= control target key end

     0   :  { %6 = vsyncpa [#allocation3], 0  ;;  %s150_s0 = inlined_call_operand.hbm [shape: f32[16,128], index: 0, kind: input, shape index: {}]   ;;  %s151_s1 = inlined_call_operand.hbm [shape: f32[16,128], index: 1, kind: output, shape index: {}]  }
   0x1   :  { %7 = vsyncpa [#allocation4], 0  ;;  %s105_s6 = smov [#allocation2]   ;;  %s57_s10 = scalar_lea.hbm %s150_s0, 256 }
   0x2   :  { %s13_s7 = sshll.u32 %s105_s6, 4  ;;  %p58_p0 = scmp.ne.s32.totalorder %s150_s0, %s57_s10  ;;  %s14_s7 = int_to_ptr.vmem [resolvable:$true] %s13_s7 }
   0x3   :  { %p61_p1 = scmp.lt.u32.totalorder %s57_s10, %s150_s0 }
   0x5   :  { %p63_p2 = pnand %p61_p1, %p58_p0 }
   0x7   :  { %66 = shalt.err (!%p63_p2)
}
   0x8   :  { %s67_s15 = scalar_lea.vmem %s14_s7, 256  ;;  %p72_p4 = scmp.lt.s32.totalorder %s14_s7, %s14_s7 }
   0x9   :  { %p68_p3 = scmp.ne.s32.totalorder %s14_s7, %s67_s15  ;;  %p73_p5 = scmp.lt.s32.totalorder %s67_s15, %s67_s15 }
   0xb   :  { %p74_p6 = por %p73_p5, %p72_p4 }
   0xd   :  { %p75_p7 = pnand %p74_p6, %p68_p3 }
   0xf   :  { %78 = shalt.err (!%p75_p7)
}
  0x10   :  { %s106_s16 = smov 128   ;;  %s107_s17 = smov 8  }
  0x11   :  { %19 = dma.hbm_to_vmem [thread:$0]  %s150_s0, 256, %s14_s7, [#allocation3], %s106_s16, %s106_s16, %s107_s17  }
  0x12   :  { %101 = dma.done.wait [#allocation3], 256  }
  0x13   :  { %102 = vsyncadd [#allocation3], 4294967040  ;;  %v23_v0 = vld [vmem:[#allocation2] sm:$0xff]  ;;  %v24_v1 = vld [vmem:[#allocation2 + $0x8] sm:$0xff]  ;;  %s108_s20 = smov [#allocation5]   ;;  %v109_v2 = vmov 0.0  }
  0x14   :  { %s40_s21 = sshll.u32 %s108_s20, 4  ;;  %vm25_vm0 = vcmp.gt.f32.partialorder %v23_v0, 0.5  ;;  %vm27_vm1 = vcmp.lt.f32.partialorder %v23_v0, -0.5  ;;  %vm26_vm2 = vcmp.gt.f32.partialorder %v24_v1, 0.5  ;;  %vm28_vm3 = vcmp.lt.f32.partialorder %v24_v1, -0.5  ;;  %s41_s21 = int_to_ptr.vmem [resolvable:$true] %s40_s21 }
  0x15   :  { %vm29_vm4 = vmor %vm25_vm0, %vm27_vm1  ;;  %s79_s22 = scalar_lea.vmem %s41_s21, 256  ;;  %p84_p9 = scmp.lt.s32.totalorder %s41_s21, %s41_s21 }
  0x16   :  { %v31_v3 = vsel %vm29_vm4, 2.0, %v109_v2  ;;  %vm30_vm5 = vmor %vm26_vm2, %vm28_vm3  ;;  %p80_p8 = scmp.ne.s32.totalorder %s41_s21, %s79_s22  ;;  %p85_p10 = scmp.lt.s32.totalorder %s79_s22, %s79_s22 }
  0x17   :  { %33 = vst [vmem:[#allocation5] sm:$0xff] %v31_v3  ;;  %v32_v4 = vsel %vm30_vm5, 2.0, %v109_v2 }
  0x18   :  { %34 = vst [vmem:[#allocation5 + $0x8] sm:$0xff] %v32_v4  ;;  %p86_p11 = por %p85_p10, %p84_p9 }
  0x1a   :  { %p87_p12 = pnand %p86_p11, %p80_p8 }
  0x1c   :  { %90 = shalt.err (!%p87_p12)
}
  0x1d   :  { %s91_s24 = scalar_lea.hbm %s151_s1, 256 }
  0x1e   :  { %p92_p13 = scmp.ne.s32.totalorder %s151_s1, %s91_s24  ;;  %p95_p0 = scmp.lt.u32.totalorder %s91_s24, %s151_s1 }
  0x20   :  { %p97_p1 = pnand %p95_p0, %p92_p13 }
  0x22   :  { %100 = shalt.err (!%p97_p1)
}
  0x23   :  { %46 = dma.vmem_to_hbm [thread:$0]  %s41_s21, 256, %s151_s1, [#allocation4], %s106_s16, %s106_s16, %s107_s17  }
  0x24   :  { %103 = dma.done.wait [#allocation4], 256  }
  0x25   :  { %104 = vsyncadd [#allocation4], 4294967040 }
  0x26   :  { %50 = vsyncpa [#allocation3], 1 }
  0x27   :  { %51 = vsyncpa [#allocation4], 1 }

</bundles_post_ra>
